<compile_context>
chip_gen: v6e
topology: v6e:2x2x1
jax: 0.10.0
libtpu: 0.0.40
codegen_flags: <defaults>
</compile_context>

<pallas_src>
import jax
import jax.numpy as jnp
from jax.experimental import pallas as pl
from jax.experimental.pallas import tpu as pltpu


def make_encoder_kernel(in_out, h1, h2, z_dim):
    """Kernel over one batch tile; all feature dims are static closure ints."""

    def kernel(xT_ref, noiseT_ref, wb_ref, zT_ref):
        xT = xT_ref[...]            # (in_out, TB)  f32, batch on lanes
        wb = wb_ref[...]            # (R, C) packed weights+biases (tiny)

        r = 0
        w1 = wb[r:r + h1, :in_out]                  # (h1, in_out)
        b1 = wb[r:r + h1, in_out:in_out + 1]        # (h1, 1)
        r += h1
        w2 = wb[r:r + h2, :h1]
        b2 = wb[r:r + h2, h1:h1 + 1]
        r += h2
        w3 = wb[r:r + h2, :h2]
        b3 = wb[r:r + h2, h2:h2 + 1]
        r += h2
        wh = wb[r:r + 2 * z_dim, :h2]               # fused mu|logvar head
        bh = wb[r:r + 2 * z_dim, h2:h2 + 1]

        # Linear(in_out, 25) + ReLU
        h = jnp.dot(w1, xT, preferred_element_type=jnp.float32) + b1
        h = jnp.maximum(h, 0.0)
        # TODO(synk): Dropout(0.2) is training-only; inference forward is identity.

        # Linear(25, 20) + ReLU
        h = jnp.dot(w2, h, preferred_element_type=jnp.float32) + b2
        h = jnp.maximum(h, 0.0)

        # Linear(20, 20) + ReLU
        h = jnp.dot(w3, h, preferred_element_type=jnp.float32) + b3
        h = jnp.maximum(h, 0.0)

        # Fused mu / logvar heads: one matmul, slice the two halves.
        head = jnp.dot(wh, h, preferred_element_type=jnp.float32) + bh  # (2*z_dim, TB)
        mu = head[:z_dim, :]
        logvar = head[z_dim:, :]

        # Reparameterization: z = rand * exp(logvar/2) + mu.
        # Noise is passed in (host-side torch.rand equivalent) so the result is
        # bit-checkable against a pure-JAX reference; it could instead be drawn
        # in-kernel with pltpu.prng_seed + pltpu.prng_random_bits.
        zT_ref[...] = noiseT_ref[...] * jnp.exp(logvar * 0.5) + mu

    return kernel


def pack_params(params, in_out, h1, h2, z_dim):
    """Pack all weights (transposed to [out, in]) + biases into one f32 buffer.

    Row blocks: [W1|b1] (h1 rows), [W2|b2] (h2), [W3|b3] (h2), [Wmu;Wlv|bmu;blv]
    (2*z_dim). Columns: [0:fan_in] = W row, column [fan_in] = bias. Zero-padded.
    """
    cols = max(in_out, h1, h2) + 1
    rows = h1 + h2 + h2 + 2 * z_dim
    buf = jnp.zeros((rows, cols), jnp.float32)

    def put(buf, r, w_in_out, b_flat, fan_in):
        wT = jnp.asarray(w_in_out, jnp.float32).T          # [out, in]
        out = wT.shape[0]
        buf = buf.at[r:r + out, :fan_in].set(wT)
        buf = buf.at[r:r + out, fan_in].set(jnp.asarray(b_flat, jnp.float32).reshape(-1))
        return buf, r + out

    buf, r = put(buf, 0, params["w1"], params["b1"], in_out)
    buf, r = put(buf, r, params["w2"], params["b2"], h1)
    buf, r = put(buf, r, params["w3"], params["b3"], h2)
    w_head = jnp.concatenate([params["wmu"], params["wlv"]], axis=1)     # [h2, 2*z_dim]
    b_head = jnp.concatenate(
        [params["bmu"].reshape(-1), params["blv"].reshape(-1)], axis=0)  # [2*z_dim]
    buf, r = put(buf, r, w_head, b_head, h2)
    return buf


def encoder_generator_forward(x, noise, params, *, tile_b=256,
                              vmem_limit_bytes=32 * 1024 * 1024):
    """x: (B, in_out) f32; noise: (B, z_dim) uniform [0,1) f32. Returns (B, z_dim)."""
    B, in_out = x.shape
    z_dim = noise.shape[1]
    h1 = params["w1"].shape[1]
    h2 = params["w2"].shape[1]

    # Pad batch to a multiple of the lane tile and transpose so batch -> lanes.
    B_pad = pl.cdiv(B, tile_b) * tile_b
    xT = jnp.zeros((in_out, B_pad), jnp.float32).at[:, :B].set(x.T)
    noiseT = jnp.zeros((z_dim, B_pad), jnp.float32).at[:, :B].set(noise.T)
    wb = pack_params(params, in_out, h1, h2, z_dim)
    R, C = wb.shape

    grid = (B_pad // tile_b,)
    kernel = make_encoder_kernel(in_out, h1, h2, z_dim)

    zT = pl.pallas_call(
        kernel,
        out_shape=jax.ShapeDtypeStruct((z_dim, B_pad), jnp.float32),
        grid_spec=pltpu.PrefetchScalarGridSpec(
            num_scalar_prefetch=0,
            grid=grid,
            in_specs=[
                pl.BlockSpec((in_out, tile_b), lambda i: (0, i)),  # xT (lane-dense)
                pl.BlockSpec((z_dim, tile_b), lambda i: (0, i)),   # noiseT
                pl.BlockSpec((R, C), lambda i: (0, 0)),            # packed weights
            ],
            out_specs=pl.BlockSpec((z_dim, tile_b), lambda i: (0, i)),
        ),
        compiler_params=pltpu.CompilerParams(
            dimension_semantics=("parallel",),       # megacore-shardable batch axis
            vmem_limit_bytes=vmem_limit_bytes,
        ),
    )(xT, noiseT, wb)

    return zT[:, :B].T


def init_params(key, in_out, z_dim):
    """Deterministic PyTorch-style Linear init: U(-1/sqrt(fan_in), 1/sqrt(fan_in))."""
    h1, h2 = 25, 20
    layer_dims = [
        ("w1", "b1", in_out, h1),
        ("w2", "b2", h1, h2),
        ("w3", "b3", h2, h2),
        ("wmu", "bmu", h2, z_dim),
        ("wlv", "blv", h2, z_dim),
    ]
    params = {}
    for wname, bname, fan_in, fan_out in layer_dims:
        key, kw, kb = jax.random.split(key, 3)
        bound = 1.0 / jnp.sqrt(jnp.float32(fan_in))
        params[wname] = jax.random.uniform(
            kw, (fan_in, fan_out), jnp.float32, -bound, bound)
        params[bname] = jax.random.uniform(
            kb, (1, fan_out), jnp.float32, -bound, bound)
    return params


if __name__ == "__main__":
    in_out = 30   # self.dim
    z_dim = 10    # self.z_dim
    B = 16        # batch

    key = jax.random.PRNGKey(0)
    kparams, kx, knoise = jax.random.split(key, 3)

    params = init_params(kparams, in_out, z_dim)
    x = jax.random.normal(kx, (B, in_out), jnp.float32)
    # torch.rand -> Uniform[0, 1)
    noise = jax.random.uniform(knoise, (B, z_dim), jnp.float32)

    z = encoder_generator_forward(x, noise, params, tile_b=256)
    jax.block_until_ready(z)

    # Pure-JAX reference check for sanity.
    def ref(x, noise, p):
        h = jnp.maximum(x @ p["w1"] + p["b1"], 0.0)
        h = jnp.maximum(h @ p["w2"] + p["b2"], 0.0)
        h = jnp.maximum(h @ p["w3"] + p["b3"], 0.0)
        mu = h @ p["wmu"] + p["bmu"]
        logvar = h @ p["wlv"] + p["blv"]
        return noise * jnp.exp(logvar / 2.0) + mu

    z_ref = ref(x, noise, params)
    assert z.shape == (B, z_dim)
    assert jnp.allclose(z, z_ref, atol=1e-5, rtol=1e-5), float(
        jnp.max(jnp.abs(z - z_ref)))

    print("KERNEL_OK")
</pallas_src>

<mosaic_0001>
module attributes {stable_mosaic.version = 11 : i64} {
  func.func @kernel(%arg0: i32, %arg1: memref<30x256xf32, #tpu.memory_space<vmem>>, %arg2: memref<10x256xf32, #tpu.memory_space<vmem>>, %arg3: memref<85x31xf32, #tpu.memory_space<vmem>>, %arg4: memref<10x256xf32, #tpu.memory_space<vmem>>) attributes {dimension_semantics = [#tpu.dimension_semantics<parallel>], iteration_bounds = array<i64: 1>, scalar_prefetch = 0 : i64, scratch_operands = 0 : i64, tpu.core_type = #tpu.core_type<tc>, window_params = [{transform_indices = @transform_0, window_bounds = array<i64: 30, 256>}, {transform_indices = @transform_1, window_bounds = array<i64: 10, 256>}, {pipeline_mode = #tpu.pipeline_mode<synchronous>, transform_indices = @transform_2, window_bounds = array<i64: 85, 31>}, {transform_indices = @transform_3, window_bounds = array<i64: 10, 256>}]} {
    %c0 = arith.constant 0 : index
    %c0_0 = arith.constant 0 : index
    %0 = vector.load %arg1[%c0, %c0_0] : memref<30x256xf32, #tpu.memory_space<vmem>>, vector<30x256xf32>
    %c0_1 = arith.constant 0 : index
    %c0_2 = arith.constant 0 : index
    %1 = vector.load %arg3[%c0_1, %c0_2] : memref<85x31xf32, #tpu.memory_space<vmem>>, vector<85x31xf32>
    %2 = vector.extract_strided_slice %1 {offsets = [0, 0], sizes = [25, 30], strides = [1, 1]} : vector<85x31xf32> to vector<25x30xf32>
    %3 = vector.extract_strided_slice %1 {offsets = [0, 30], sizes = [25, 1], strides = [1, 1]} : vector<85x31xf32> to vector<25x1xf32>
    %4 = vector.extract_strided_slice %1 {offsets = [25, 0], sizes = [20, 25], strides = [1, 1]} : vector<85x31xf32> to vector<20x25xf32>
    %5 = vector.extract_strided_slice %1 {offsets = [25, 25], sizes = [20, 1], strides = [1, 1]} : vector<85x31xf32> to vector<20x1xf32>
    %6 = vector.extract_strided_slice %1 {offsets = [45, 0], sizes = [20, 20], strides = [1, 1]} : vector<85x31xf32> to vector<20x20xf32>
    %7 = vector.extract_strided_slice %1 {offsets = [45, 20], sizes = [20, 1], strides = [1, 1]} : vector<85x31xf32> to vector<20x1xf32>
    %8 = vector.extract_strided_slice %1 {offsets = [65, 0], sizes = [20, 20], strides = [1, 1]} : vector<85x31xf32> to vector<20x20xf32>
    %9 = vector.extract_strided_slice %1 {offsets = [65, 20], sizes = [20, 1], strides = [1, 1]} : vector<85x31xf32> to vector<20x1xf32>
    %cst = arith.constant dense<0.000000e+00> : vector<25x256xf32>
    %10 = tpu.matmul %2, %0, %cst {dimension_numbers = #tpu.dot_dimension_numbers<[1], [0], [0], [1], [0, 0, 1, 1], [], []>} : vector<25x30xf32>, vector<30x256xf32>, vector<25x256xf32> -> vector<25x256xf32>
    %11 = vector.broadcast %3 : vector<25x1xf32> to vector<25x256xf32>
    %12 = arith.addf %10, %11 : vector<25x256xf32>
    %cst_3 = arith.constant 0.000000e+00 : f32
    %13 = vector.broadcast %cst_3 : f32 to vector<25x256xf32>
    %14 = arith.maximumf %12, %13 : vector<25x256xf32>
    %cst_4 = arith.constant dense<0.000000e+00> : vector<20x256xf32>
    %15 = tpu.matmul %4, %14, %cst_4 {dimension_numbers = #tpu.dot_dimension_numbers<[1], [0], [0], [1], [0, 0, 1, 1], [], []>} : vector<20x25xf32>, vector<25x256xf32>, vector<20x256xf32> -> vector<20x256xf32>
    %16 = vector.broadcast %5 : vector<20x1xf32> to vector<20x256xf32>
    %17 = arith.addf %15, %16 : vector<20x256xf32>
    %cst_5 = arith.constant 0.000000e+00 : f32
    %18 = vector.broadcast %cst_5 : f32 to vector<20x256xf32>
    %19 = arith.maximumf %17, %18 : vector<20x256xf32>
    %cst_6 = arith.constant dense<0.000000e+00> : vector<20x256xf32>
    %20 = tpu.matmul %6, %19, %cst_6 {dimension_numbers = #tpu.dot_dimension_numbers<[1], [0], [0], [1], [0, 0, 1, 1], [], []>} : vector<20x20xf32>, vector<20x256xf32>, vector<20x256xf32> -> vector<20x256xf32>
    %21 = vector.broadcast %7 : vector<20x1xf32> to vector<20x256xf32>
    %22 = arith.addf %20, %21 : vector<20x256xf32>
    %cst_7 = arith.constant 0.000000e+00 : f32
    %23 = vector.broadcast %cst_7 : f32 to vector<20x256xf32>
    %24 = arith.maximumf %22, %23 : vector<20x256xf32>
    %cst_8 = arith.constant dense<0.000000e+00> : vector<20x256xf32>
    %25 = tpu.matmul %8, %24, %cst_8 {dimension_numbers = #tpu.dot_dimension_numbers<[1], [0], [0], [1], [0, 0, 1, 1], [], []>} : vector<20x20xf32>, vector<20x256xf32>, vector<20x256xf32> -> vector<20x256xf32>
    %26 = vector.broadcast %9 : vector<20x1xf32> to vector<20x256xf32>
    %27 = arith.addf %25, %26 : vector<20x256xf32>
    %28 = vector.extract_strided_slice %27 {offsets = [0, 0], sizes = [10, 256], strides = [1, 1]} : vector<20x256xf32> to vector<10x256xf32>
    %29 = vector.extract_strided_slice %27 {offsets = [10, 0], sizes = [10, 256], strides = [1, 1]} : vector<20x256xf32> to vector<10x256xf32>
    %c0_9 = arith.constant 0 : index
    %c0_10 = arith.constant 0 : index
    %30 = vector.load %arg2[%c0_9, %c0_10] : memref<10x256xf32, #tpu.memory_space<vmem>>, vector<10x256xf32>
    %cst_11 = arith.constant 5.000000e-01 : f32
    %31 = vector.broadcast %cst_11 : f32 to vector<10x256xf32>
    %32 = arith.mulf %29, %31 : vector<10x256xf32>
    %33 = math.exp %32 : vector<10x256xf32>
    %34 = arith.mulf %30, %33 : vector<10x256xf32>
    %35 = arith.addf %34, %28 : vector<10x256xf32>
    %c0_12 = arith.constant 0 : index
    %c0_13 = arith.constant 0 : index
    %36 = vector.load %arg4[%c0_12, %c0_13] : memref<10x256xf32, #tpu.memory_space<vmem>>, vector<10x256xf32>
    tpu.vector_store %arg4[%c0_12, %c0_13], %35 {strides = array<i32>} : memref<10x256xf32, #tpu.memory_space<vmem>>, vector<10x256xf32>,
    return
  }
  func.func @transform_0(%arg0: i32) -> (i32, i32) {
    %c0_i32 = arith.constant 0 : i32
    %c0_i32_0 = arith.constant 0 : i32
    return %c0_i32, %arg0 : i32, i32
  }
  func.func @transform_1(%arg0: i32) -> (i32, i32) {
    %c0_i32 = arith.constant 0 : i32
    %c0_i32_0 = arith.constant 0 : i32
    return %c0_i32, %arg0 : i32, i32
  }
  func.func @transform_2(%arg0: i32) -> (i32, i32) {
    %c0_i32 = arith.constant 0 : i32
    %c0_i32_0 = arith.constant 0 : i32
    %c0_i32_1 = arith.constant 0 : i32
    return %c0_i32, %c0_i32_0 : i32, i32
  }
  func.func @transform_3(%arg0: i32) -> (i32, i32) {
    %c0_i32 = arith.constant 0 : i32
    %c0_i32_0 = arith.constant 0 : i32
    return %c0_i32, %arg0 : i32, i32
  }
}

</mosaic_0001>

<bundles_post_ra>
// kernel: tpu_custom_call.1
= control target key start
LH: loop header
LB: loop body
LE: loop exit
PB: predicated region body
PF: predicated region fallthrough
CT: control target
= control target key end

     0   :  { %vm63_vm0 = vcmask 1045504   ;;  %v669_v5 = vmov 0.0   ;;  %v670_v8 = vmov 30   ;;  %s832_s0 = inlined_call_operand.vmem [shape: f32[30,256], index: 0, kind: input, shape index: {}]   ;;  %s833_s1 = inlined_call_operand.vmem [shape: f32[10,256], index: 1, kind: input, shape index: {}]   ;;  %s834_s2 = inlined_call_operand.vmem [shape: f32[85,31], index: 2, kind: input, shape index: {}]   ;;  %s835_s3 = inlined_call_operand.hbm [shape: f32[10,256], index: 3, kind: output, shape index: {}]  }
   0x1   :  { %v22_v0 = vld [vmem:[%s832_s0 + $0x38] sm:$0x3f]  ;;  %v21_v1 = vld [vmem:[%s832_s0 + $0x30] sm:$0x3f]  ;;  %v20_v2 = vld [vmem:[%s832_s0 + $0x28] sm:$0xff]  ;;  %134 = vmatprep.mubr.f32.mxu0 %v669_v5  ;;  %634 = vset.pattern.permute.xlu1 %v670_v8 }
   0x2   :  { %605 = vmatprep.subr.msk.mxu0 %vm63_vm0, %v22_v0  ;;  %v19_v3 = vld [vmem:[%s832_s0 + $0x20] sm:$0xff]  ;;  %v18_v4 = vld [vmem:[%s832_s0 + $0x18] sm:$0xff]  ;;  %v17_v6 = vld [vmem:[%s832_s0 + $0x10] sm:$0xff] }
   0x3   :  { %606 = vmatpush1.msk.msra.mxu0 %vm63_vm0, %v21_v1  ;;  %v24_v7 = vld [vmem:[%s834_s2 + $0x8] sm:$0xff] }
   0x4   :  { %96 = vmatprep.subr.mxu0 %v20_v2  ;;  %v16_v9 = vld [vmem:[%s832_s0 + $0x8] sm:$0xff]  ;;  %41 = vperm.xlu1 %634, %v24_v7  }
   0x5   :  { %97 = vmatpush1.msra.mxu0 %v19_v3 }
   0x6   :  { %8 = vsyncpa [#allocation3], 0  ;;  %98 = vmatprep.subr.mxu0 %v18_v4  ;;  %v15_v10 = vld [vmem:[%s832_s0] sm:$0xff]  ;;  %v729_v11 = vld [vmem:[%s834_s2 + $0x18] sm:$0xff]  ;;  %633 = vset.pattern.permute.xlu0 %v670_v8  ;;  %vm54_vm1 = vcmask 244736   ;;  %v671_v16 = vmov 25  }
   0x7   :  { %99 = vmatpush1.msra.mxu0 %v17_v6  ;;  %v23_v12 = vld [vmem:[%s834_s2] sm:$0xff]  ;;  %51 = vperm.xlu0 %633, %v729_v11   ;;  %v25_v13 = vld [vmem:[%s834_s2 + $0x10] sm:$0xff]  ;;  %v750_v15 = vld [vmem:[%s834_s2 + $0x28] sm:$0xff]  ;;  %vm199_vm2 = vcmask 1040384   ;;  %v179_v39 = vrot.slane %v729_v11, 1  ;;  %vm178_vm3 = vcmask 1046528  }
   0x8   :  { %100 = vmatprep.subr.mxu0 %v16_v9  ;;  %270 = vmatprep.mubr.f32.mxu1 %v669_v5  ;;  %v27_v14 = vld [vmem:[%s834_s2 + $0x20] sm:$0xff]  ;;  %vm192_vm4 = vcmask 203776   ;;  %v182_v48 = vrot.slane %v750_v15, 1  ;;  %v29_v50 = vld [vmem:[%s834_s2 + $0x30] sm:$0xff]  ;;  %v30_v51 = vld [vmem:[%s834_s2 + $0x38] sm:$0xff]  ;;  %vm310_vm5 = vcmask 1042432  }
   0x9   :  { %101 = vmatpush1.msra.mxu0 %v15_v10  ;;  %36 = vperm.xlu1 %634, %v23_v12   ;;  %v180_v42 = vrot.slane %v27_v14, 1  ;;  %v312_v52 = vrot.slane %v29_v50, 5  ;;  %v314_v53 = vrot.slane %v30_v51, 5  ;;  %v31_v55 = vld [vmem:[%s834_s2 + $0x40] sm:$0xff]  ;;  %v32_v58 = vld [vmem:[%s834_s2 + $0x48] sm:$0xff]  ;;  %v672_v60 = vmov 20  }
   0xa   :  { %607 = vmatmul.mubr.msk.f32.vlgmr.msra.gmra.mxu0 %vm54_vm1, %v23_v12  ;;  %v316_v56 = vrot.slane %v31_v55, 5  ;;  %v439_v59 = vrot.slane %v31_v55, 1  ;;  %v440_v61 = vrot.slane %v32_v58, 1  ;;  %v782_v63 = vld [vmem:[%s834_s2 + $0x50] sm:$0x1f]  ;;  %vm335_vm6 = vcmask 1043456  }
   0xb   :  { %140 = vmatprep.mubr.f32.mxu0 %v669_v5  ;;  %46 = vperm.xlu0 %633, %v25_v13   ;;  %v181_v47 = vsel %vm178_vm3, %v179_v39, %v180_v42  ;;  %v183_v49 = vsel %vm178_vm3, %v180_v42, %v182_v48  ;;  %v315_v54 = vsel %vm310_vm5, %v312_v52, %v314_v53  ;;  %vm328_vm7 = vcmask 162816   ;;  %s673_s29 = smov [#allocation2]  }
   0xc   :  { %v317_v57 = vsel %vm310_vm5, %v314_v53, %v316_v56  ;;  %v776_v62 = vsel %vm178_vm3, %v439_v59, %v440_v61  ;;  %s594_s30 = sshll.u32 %s673_s29, 4  ;;  %s595_s30 = int_to_ptr.vmem [resolvable:$true] %s594_s30 }
   0xd   :  { %636 = vset.pattern.permute.xlu1 %v671_v16  ;;  %p652_p1 = scmp.lt.s32.totalorder %s595_s30, %s595_s30 }
   0xe   :  { %608 = vmatmul.mubr.msk.f32.gmra.mxu0 %vm54_vm1, %v24_v7  ;;  %172 = vperm.xlu1 %636, %v27_v14  }
   0xf   :  { %146 = vmatprep.mubr.f32.mxu0 %v669_v5  ;;  %635 = vset.pattern.permute.xlu0 %v671_v16 }
  0x10   :  { %176 = vperm.xlu0 %635, %v750_v15  }
  0x12   :  { %609 = vmatmul.mubr.msk.f32.gmra.mxu0 %vm54_vm1, %v25_v13  ;;  %168 = vperm.xlu1 %636, %v729_v11  }
  0x13   :  { %152 = vmatprep.mubr.f32.mxu0 %v669_v5 }
  0x14   :  { %637 = vset.pattern.permute.xlu0 %v672_v60 }
  0x15   :  { %304 = vperm.xlu0 %637, %v30_v51  }
  0x16   :  { %610 = vmatmul.mubr.msk.f32.gmra.mxu0 %vm54_vm1, %v729_v11  ;;  %638 = vset.pattern.permute.xlu1 %v672_v60 }
  0x17   :  { %528 = vmatprep.mubr.f32.mxu0 %v669_v5  ;;  %308 = vperm.xlu1 %638, %v31_v55  }
  0x19   :  { %296 = vperm.xlu0 %637, %v750_v15  }
  0x1b   :  { %300 = vperm.xlu1 %638, %v29_v50  }
  0x1d   :  { %437 = vperm.xlu0 %637, %v782_v63  }
  0x1f   :  { %433 = vperm.xlu1 %638, %v32_v58  }
  0x7f   :  { %v42_v24 = vpop.permute.xlu1 %41 }
  0x82   :  { %v52_v21 = vpop.permute.xlu0 %51 }
  0x84   :  { %v37_v32 = vpop.permute.xlu1 %36 }
  0x86   :  { %v47_v26 = vpop.permute.xlu0 %46 }
  0x89   :  { %v173_v0 = vpop.permute.xlu1 %172 }
  0x8a   :  { %v185_v9 = vrot.slane %v173_v0, 1 }
  0x8b   :  { %v177_v2 = vpop.permute.xlu0 %176 }
  0x8c   :  { %v187_v7 = vrot.slane %v177_v2, 1 }
  0x8d   :  { %v169_v4 = vpop.permute.xlu1 %168 }
  0x8e   :  { %v184_v10 = vrot.slane %v169_v4, 1  ;;  %v188_v12 = vsel %vm178_vm3, %v185_v9, %v187_v7 }
  0x90   :  { %v186_v16 = vsel %vm178_vm3, %v184_v10, %v185_v9 }
  0xca   :  { %v136_v17 = vpop.f32.mrf.mxu0 }
  0xcb   :  { %v137_v40 = vadd.f32 %v136_v17, %v37_v32 }
  0xcc   :  { %v138_v18 = vpop.f32.mrf.mxu0 }
  0xcd   :  { %v139_v37 = vadd.f32 %v138_v18, %v37_v32  ;;  %v159_v46 = vmax.f32 %v137_v40, 0.0  ;;  %v798_v32 = vpop.permute.xlu1 %308 }
  0xce   :  { %v142_v19 = vpop.f32.mrf.mxu0 }
  0xcf   :  { %v143_v35 = vadd.f32 %v142_v19, %v42_v24  ;;  %v160_v45 = vmax.f32 %v139_v37, 0.0 }
  0xd0   :  { %v144_v20 = vpop.f32.mrf.mxu0 }
  0xd1   :  { %v145_v33 = vadd.f32 %v144_v20, %v42_v24  ;;  %v161_v44 = vmax.f32 %v143_v35, 0.0  ;;  %v311_v24 = vrot.slane %v750_v15, 5  ;;  %v442_v15 = vrot.slane %v782_v63, 1  ;;  %v301_v37 = vpop.permute.xlu1 %300 }
  0xd2   :  { %v148_v22 = vpop.f32.mrf.mxu0  ;;  %v323_v35 = vrot.slane %v798_v32, 5  ;;  %v319_v42 = vrot.slane %v301_v37, 5 }
  0xd3   :  { %v149_v31 = vadd.f32 %v148_v22, %v47_v26  ;;  %v162_v43 = vmax.f32 %v145_v33, 0.0 }
  0xd4   :  { %v150_v23 = vpop.f32.mrf.mxu0 }
  0xd5   :  { %v151_v29 = vadd.f32 %v150_v23, %v47_v26  ;;  %v163_v41 = vmax.f32 %v149_v31, 0.0  ;;  %v305_v31 = vpop.permute.xlu0 %304 }
  0xd6   :  { %v154_v25 = vpop.f32.mrf.mxu0  ;;  %v321_v39 = vrot.slane %v305_v31, 5 }
  0xd7   :  { %v155_v27 = vadd.f32 %v154_v25, %v52_v21  ;;  %v164_v38 = vmax.f32 %v151_v29, 0.0  ;;  %v313_v29 = vsel %vm310_vm5, %v311_v24, %v312_v52  ;;  %v549_v24 = vld [vmem:[%s833_s1 + $0x10] sm:$0x3] }
  0xd8   :  { %v156_v28 = vpop.f32.mrf.mxu0 }
  0xd9   :  { %v157_v30 = vadd.f32 %v156_v28, %v52_v21  ;;  %v165_v36 = vmax.f32 %v155_v27, 0.0 }
  0xdb   :  { %v166_v34 = vmax.f32 %v157_v30, 0.0  ;;  %v443_v30 = vsel %vm178_vm3, %v440_v61, %v442_v15  ;;  %v434_v61 = vpop.permute.xlu1 %433 }
  0xdc   :  { %v445_v0 = vrot.slane %v434_v61, 1 }
  0xdd   :  { %611 = vmatprep.subr.msk.mxu1 %vm199_vm2, %v166_v34 }
  0xde   :  { %612 = vmatpush1.msk.msra.mxu1 %vm199_vm2, %v165_v36  ;;  %v297_v36 = vpop.permute.xlu0 %296 }
  0xdf   :  { %232 = vmatprep.subr.mxu1 %v164_v38 }
  0xe0   :  { %233 = vmatpush1.msra.mxu1 %v163_v41  ;;  %v318_v41 = vrot.slane %v297_v36, 5 }
  0xe1   :  { %234 = vmatprep.subr.mxu1 %v162_v43  ;;  %v324_v43 = vsel %vm310_vm5, %v321_v39, %v323_v35 }
  0xe2   :  { %235 = vmatpush1.msra.mxu1 %v161_v44  ;;  %v438_v60 = vpop.permute.xlu0 %437 }
  0xe3   :  { %236 = vmatprep.subr.mxu1 %v160_v45  ;;  %v322_v45 = vsel %vm310_vm5, %v319_v42, %v321_v39  ;;  %v447_v63 = vrot.slane %v438_v60, 1 }
  0xe4   :  { %237 = vmatpush1.msra.mxu1 %v159_v46 }
  0xe5   :  { %613 = vmatmul.mubr.msk.f32.vlgmr.msra.gmra.mxu1 %vm192_vm4, %v181_v47 }
  0xe6   :  { %276 = vmatprep.mubr.f32.mxu1 %v669_v5 }
  0xe9   :  { %614 = vmatmul.mubr.msk.f32.gmra.mxu1 %vm192_vm4, %v183_v49 }
  0xea   :  { %282 = vmatprep.mubr.f32.mxu1 %v669_v5 }
  0xed   :  { %615 = vmatmul.mubr.msk.f32.gmra.mxu1 %vm192_vm4, %v182_v48  ;;  %v320_v48 = vsel %vm310_vm5, %v318_v41, %v319_v42 }
  0xee   :  { %406 = vmatprep.mubr.f32.mxu1 %v669_v5 }
 0x1a5   :  { %v272_v1 = vpop.f32.mrf.mxu1 }
 0x1a6   :  { %v273_v22 = vadd.f32 %v272_v1, %v186_v16 }
 0x1a7   :  { %v274_v3 = vpop.f32.mrf.mxu1 }
 0x1a8   :  { %v275_v20 = vadd.f32 %v274_v3, %v186_v16  ;;  %v289_v28 = vmax.f32 %v273_v22, 0.0  ;;  %v448_v3 = vsel %vm178_vm3, %v445_v0, %v447_v63 }
 0x1a9   :  { %v278_v6 = vpop.f32.mrf.mxu1 }
 0x1aa   :  { %v279_v19 = vadd.f32 %v278_v6, %v188_v12  ;;  %v290_v27 = vmax.f32 %v275_v20, 0.0 }
 0x1ab   :  { %v280_v8 = vpop.f32.mrf.mxu1 }
 0x1ac   :  { %v281_v17 = vadd.f32 %v280_v8, %v188_v12  ;;  %v291_v26 = vmax.f32 %v279_v19, 0.0 }
 0x1ad   :  { %v284_v11 = vpop.f32.mrf.mxu1 }
 0x1ae   :  { %v285_v13 = vadd.f32 %v284_v11, %v187_v7  ;;  %v292_v25 = vmax.f32 %v281_v17, 0.0 }
 0x1af   :  { %v286_v14 = vpop.f32.mrf.mxu1 }
 0x1b0   :  { %v287_v18 = vadd.f32 %v286_v14, %v187_v7  ;;  %v293_v23 = vmax.f32 %v285_v13, 0.0 }
 0x1b2   :  { %v294_v21 = vmax.f32 %v287_v18, 0.0 }
 0x1b4   :  { %616 = vmatprep.subr.msk.mxu1 %vm335_vm6, %v294_v21  ;;  %v444_v21 = vrot.slane %v798_v32, 1 }
 0x1b5   :  { %617 = vmatpush1.msk.msra.mxu1 %vm335_vm6, %v293_v23 }
 0x1b6   :  { %370 = vmatprep.subr.mxu1 %v292_v25 }
 0x1b7   :  { %371 = vmatpush1.msra.mxu1 %v291_v26  ;;  %v547_v26 = vld [vmem:[%s833_s1] sm:$0xff] }
 0x1b8   :  { %372 = vmatprep.subr.mxu1 %v290_v27 }
 0x1b9   :  { %373 = vmatpush1.msra.mxu1 %v289_v28 }
 0x1ba   :  { %618 = vmatmul.mubr.msk.f32.vlgmr.msra.gmra.mxu1 %vm328_vm7, %v313_v29  ;;  %v446_v29 = vsel %vm178_vm3, %v444_v21, %v445_v0 }
 0x1bb   :  { %412 = vmatprep.mubr.f32.mxu1 %v669_v5 }
 0x1be   :  { %619 = vmatmul.mubr.msk.f32.gmra.mxu1 %vm328_vm7, %v315_v54 }
 0x1bf   :  { %418 = vmatprep.mubr.f32.mxu1 %v669_v5 }
 0x1c2   :  { %620 = vmatmul.mubr.msk.f32.gmra.mxu1 %vm328_vm7, %v317_v57 }
 0x27a   :  { %v408_v33 = vpop.f32.mrf.mxu1 }
 0x27b   :  { %v409_v54 = vadd.f32 %v408_v33, %v320_v48  ;;  %v548_v33 = vld [vmem:[%s833_s1 + $0x8] sm:$0xff] }
 0x27c   :  { %v410_v34 = vpop.f32.mrf.mxu1 }
 0x27d   :  { %v411_v52 = vadd.f32 %v410_v34, %v320_v48  ;;  %v425_v59 = vmax.f32 %v409_v54, 0.0 }
 0x27e   :  { %v414_v38 = vpop.f32.mrf.mxu1 }
 0x27f   :  { %v415_v51 = vadd.f32 %v414_v38, %v322_v45  ;;  %v426_v58 = vmax.f32 %v411_v52, 0.0 }
 0x280   :  { %v416_v40 = vpop.f32.mrf.mxu1 }
 0x281   :  { %v417_v49 = vadd.f32 %v416_v40, %v322_v45  ;;  %v427_v57 = vmax.f32 %v415_v51, 0.0 }
 0x282   :  { %v420_v44 = vpop.f32.mrf.mxu1 }
 0x283   :  { %v421_v46 = vadd.f32 %v420_v44, %v324_v43  ;;  %v428_v56 = vmax.f32 %v417_v49, 0.0 }
 0x284   :  { %v422_v47 = vpop.f32.mrf.mxu1 }
 0x285   :  { %v423_v50 = vadd.f32 %v422_v47, %v324_v43  ;;  %v429_v55 = vmax.f32 %v421_v46, 0.0 }
 0x287   :  { %v430_v53 = vmax.f32 %v423_v50, 0.0 }
 0x289   :  { %621 = vmatprep.subr.msk.mxu0 %vm335_vm6, %v430_v53 }
 0x28a   :  { %622 = vmatpush1.msk.msra.mxu0 %vm335_vm6, %v429_v55 }
 0x28b   :  { %492 = vmatprep.subr.mxu0 %v428_v56 }
 0x28c   :  { %493 = vmatpush1.msra.mxu0 %v427_v57 }
 0x28d   :  { %494 = vmatprep.subr.mxu0 %v426_v58 }
 0x28e   :  { %495 = vmatpush1.msra.mxu0 %v425_v59 }
 0x28f   :  { %623 = vmatmul.mubr.msk.f32.vlgmr.msra.gmra.mxu0 %vm328_vm7, %v776_v62 }
 0x290   :  { %534 = vmatprep.mubr.f32.mxu0 %v669_v5 }
 0x293   :  { %624 = vmatmul.mubr.msk.f32.gmra.mxu0 %vm328_vm7, %v443_v30 }
 0x294   :  { %540 = vmatprep.mubr.f32.mxu0 %v669_v5 }
 0x297   :  { %625 = vmatmul.mubr.msk.f32.gmra.mxu0 %vm328_vm7, %v442_v15  ;;  %v550_v15 = vld [vmem:[%s833_s1 + $0x18] sm:$0x3]  ;;  %s647_s1 = scalar_lea.vmem %s595_s30, 512 }
 0x298   :  { %p648_p0 = scmp.ne.s32.totalorder %s595_s30, %s647_s1  ;;  %p653_p2 = scmp.lt.s32.totalorder %s647_s1, %s647_s1 }
 0x29a   :  { %p654_p3 = por %p653_p2, %p652_p1 }
 0x29c   :  { %p655_p4 = pnand %p654_p3, %p648_p0 }
 0x34f   :  { %v530_v1 = vpop.f32.mrf.mxu0 }
 0x350   :  { %v531_v35 = vadd.f32 %v530_v1, %v446_v29 }
 0x351   :  { %v532_v2 = vpop.f32.mrf.mxu0 }
 0x352   :  { %v533_v40 = vadd.f32 %v532_v2, %v446_v29 }
 0x353   :  { %v536_v4 = vpop.f32.mrf.mxu0 }
 0x354   :  { %v537_v6 = vadd.f32 %v536_v4, %v448_v3 }
 0x355   :  { %v538_v7 = vpop.f32.mrf.mxu0 }
 0x356   :  { %v551_v62 = vmul.f32 0.5, %v537_v6  ;;  %v539_v8 = vadd.f32 %v538_v7, %v448_v3 }
 0x357   :  { %v542_v9 = vpop.f32.mrf.mxu0 }
 0x358   :  { %v555_v10 = vmul.f32 1.442695, %v551_v62  ;;  %v552_v11 = vmul.f32 0.5, %v539_v8  ;;  %v543_v12 = vadd.f32 %v542_v9, %v447_v63 }
 0x359   :  { %v544_v5 = vpop.f32.mrf.mxu0 }
 0x35a   :  { %v557_v13 = vmul.f32 1.442695, %v552_v11  ;;  %v553_v14 = vmul.f32 0.5, %v543_v12  ;;  %v545_v16 = vadd.f32 %v544_v5, %v447_v63  ;;  %639 = vpow2.f32 %v555_v10 }
 0x35c   :  { %v559_v17 = vmul.f32 1.442695, %v553_v14  ;;  %v554_v18 = vmul.f32 0.5, %v545_v16  ;;  %641 = vpow2.f32 %v557_v13 }
 0x35e   :  { %643 = vpow2.f32 %v559_v17  ;;  %v561_v19 = vmul.f32 1.442695, %v554_v18 }
 0x360   :  { %645 = vpow2.f32 %v561_v19 }
 0x367   :  { %v640_v20 = vpop.eup %639 }
 0x368   :  { %v567_v25 = vrot.slane %v640_v20, 2 }
 0x369   :  { %v642_v22 = vpop.eup %641 }
 0x36a   :  { %v570_v30 = vrot.slane %v642_v22, 2 }
 0x36b   :  { %v644_v23 = vpop.eup %643 }
 0x36c   :  { %v568_v27 = vrot.slane %v644_v23, 2 }
 0x36d   :  { %v646_v28 = vpop.eup %645 }
 0x36e   :  { %v569_v31 = vsel %vm63_vm0, %v567_v25, %v568_v27  ;;  %v579_v32 = vmul.f32 %v568_v27, %v549_v24  ;;  %v571_v34 = vrot.slane %v646_v28, 2 }
 0x36f   :  { %v577_v36 = vmul.f32 %v569_v31, %v547_v26 }
 0x370   :  { %v583_v37 = vadd.f32 %v579_v32, %v537_v6  ;;  %v572_v38 = vsel %vm63_vm0, %v570_v30, %v571_v34  ;;  %v580_v39 = vmul.f32 %v571_v34, %v550_v15 }
 0x371   :  { %v581_v41 = vadd.f32 %v577_v36, %v531_v35  ;;  %v578_v42 = vmul.f32 %v572_v38, %v548_v33 }
 0x372   :  { %587 = vst [vmem:[#allocation2 + $0x10] sm:$0x3] %v583_v37  ;;  %v584_v43 = vadd.f32 %v580_v39, %v539_v8 }
 0x373   :  { %585 = vst [vmem:[#allocation2] sm:$0xff] %v581_v41  ;;  %v582_v44 = vadd.f32 %v578_v42, %v533_v40 }
 0x374   :  { %588 = vst [vmem:[#allocation2 + $0x18] sm:$0x3] %v584_v43 }
 0x375   :  { %586 = vst [vmem:[#allocation2 + $0x8] sm:$0xff] %v582_v44 }
 0x376   :  { %658 = shalt.err (!%p655_p4)
}
 0x377   :  { %s674_s4 = smov 256   ;;  %s675_s5 = smov 16  }
 0x378   :  { %600 = dma.vmem_to_hbm [thread:$0]  %s595_s30, 512, %s835_s3, [#allocation3], %s674_s4, %s674_s4, %s675_s5  }
 0x379   :  { %667 = dma.done.wait [#allocation3], 512  }
 0x37a   :  { %668 = vsyncadd [#allocation3], 4294966784 }
 0x37b   :  { %604 = vsyncpa [#allocation3], 1 }

</bundles_post_ra>
